<compile_context>
chip_gen: v7x
topology: tpu7x:2x2x1
jax: 0.10.0
libtpu: 0.0.40
codegen_flags: <defaults>
</compile_context>

<pallas_src>
import functools

import jax
import jax.numpy as jnp
from jax.experimental import pallas as pl
from jax.experimental.pallas import tpu as pltpu


def _mean_conv1x1_kernel(x_ref, w_ref, b_ref, o_ref, *, bt, inv_hw):
    """Fused global-average-pool + 1x1 conv for a tile of `bt` batch elements.

    x_ref: (bt, Cin, HW)  activation, natural NCHW-collapsed layout
    w_ref: (Cout, Cin)    conv weight, used as-is (no transpose anywhere)
    b_ref: (1, Cout)      conv bias
    o_ref: (bt, Cout)
    """
    w = w_ref[...]                                   # (Cout, Cin), K on lanes
    b = b_ref[...].astype(jnp.float32)               # (1, Cout)
    for i in range(bt):                              # static unroll, bt <= 8
        x_i = x_ref[i]                               # (Cin, HW), K on sublanes
        # Canonical (M,K)@(K,N) MXU matmul: (Cout,Cin)@(Cin,HW) -> (Cout,HW).
        wx = jnp.dot(w, x_i, preferred_element_type=jnp.float32)
        # Tiny lane-reduce over HW (only Cout=34 rows), mean scale folded in
        # as a scalar multiply (sum * 1/HW == mean).
        s = jnp.sum(wx, axis=-1, keepdims=True)      # (Cout, 1), f32
        out = s.T * inv_hw + b                       # (1, Cout), f32
        o_ref[pl.ds(i, 1), :] = out.astype(o_ref.dtype)


def mean_conv1x1(x_nchw, weight, bias):
    """x_nchw: (N, C, H, W); weight: (Cout, Cin); bias: (Cout,)."""
    N, C, H, W = x_nchw.shape
    Cout, Cin = weight.shape
    assert Cin == C
    HW = H * W

    # Natural layout: only collapse the spatial dims (no transpose -> no extra
    # full-activation HBM round trip before the kernel reads it).
    x_chw = x_nchw.reshape(N, C, HW)

    # Batch tile: whole batch in one block when small; multiples of 8 when the
    # batch is larger (keeps the out-block second-minor dim a multiple of 8 and
    # the ~6.7 MB x-block double-buffer inside every generation's VMEM budget).
    bt = 8 if (N > 8 and N % 8 == 0) else N
    grid = (N // bt,)

    w = weight.astype(x_nchw.dtype)                  # (Cout, Cin), used as-is
    b2d = bias.reshape(1, Cout).astype(jnp.float32)

    out_dtype = x_nchw.dtype
    itemsize = jnp.dtype(out_dtype).itemsize
    cost = pl.CostEstimate(
        flops=2 * N * Cout * Cin * HW + N * Cout * HW,
        transcendentals=0,
        bytes_accessed=(N * Cin * HW * itemsize      # activation read
                        + Cout * Cin * itemsize      # weight read (once)
                        + Cout * 4                   # bias read
                        + N * Cout * itemsize),      # output write
    )

    kernel = functools.partial(_mean_conv1x1_kernel, bt=bt, inv_hw=1.0 / HW)

    out = pl.pallas_call(
        kernel,
        out_shape=jax.ShapeDtypeStruct((N, Cout), out_dtype),
        grid=grid,
        in_specs=[
            pl.BlockSpec((bt, Cin, HW), lambda n: (n, 0, 0)),
            # Grid-invariant weight / bias: single buffer, fetched once.
            pl.BlockSpec((Cout, Cin), lambda n: (0, 0),
                         pipeline_mode=pl.Buffered(1)),
            pl.BlockSpec((1, Cout), lambda n: (0, 0),
                         pipeline_mode=pl.Buffered(1)),
        ],
        out_specs=pl.BlockSpec((bt, Cout), lambda n: (n, 0)),
        compiler_params=pltpu.CompilerParams(
            dimension_semantics=("parallel",),
            vmem_limit_bytes=32 * 1024 * 1024,
        ),
        cost_estimate=cost,
    )(x_chw, w, b2d)

    return out.reshape(N, Cout, 1, 1)


def _reference(x, weight, bias):
    r = jnp.mean(x, axis=(2, 3))                     # (N, Cin)
    r = r @ weight.T + bias[None, :]                 # (N, Cout)
    return r.reshape(x.shape[0], -1, 1, 1)


if __name__ == "__main__":
    # Shapes implied by the module: input (1, 816, 14, 14), conv 816 -> 34.
    N, Cin, H, W = 1, 816, 14, 14
    Cout = 34

    key = jax.random.PRNGKey(0)
    kx, kw, kb, kx2 = jax.random.split(key, 4)

    x = jax.random.normal(kx, (N, Cin, H, W), dtype=jnp.float32)
    # Deterministic synthetic parameters (PyTorch: weight (34,816,1,1), bias (34,)).
    weight = jax.random.normal(kw, (Cout, Cin), dtype=jnp.float32) * 0.02
    bias = jax.random.normal(kb, (Cout,), dtype=jnp.float32) * 0.02

    fn = jax.jit(mean_conv1x1)

    # Module-shape check (N = 1).
    y = fn(x, weight, bias)
    jax.block_until_ready(y)
    ref = _reference(x, weight, bias)
    assert y.shape == (N, Cout, 1, 1), y.shape
    err = float(jnp.max(jnp.abs(y - ref)))
    assert jnp.allclose(y, ref, atol=2e-3, rtol=2e-3), err

    # Batched / tiled path check (N = 16 -> bt = 8, grid of 2 parallel steps).
    x2 = jax.random.normal(kx2, (16, Cin, H, W), dtype=jnp.float32)
    y2 = fn(x2, weight, bias)
    jax.block_until_ready(y2)
    ref2 = _reference(x2, weight, bias)
    err2 = float(jnp.max(jnp.abs(y2 - ref2)))
    assert y2.shape == (16, Cout, 1, 1), y2.shape
    assert jnp.allclose(y2, ref2, atol=2e-3, rtol=2e-3), err2

    print("KERNEL_OK")
</pallas_src>

<mosaic_0001>
module attributes {stable_mosaic.version = 11 : i64} {
  func.func @_mean_conv1x1_kernel(%arg0: i32, %arg1: memref<1x816x196xf32, #tpu.memory_space<vmem>>, %arg2: memref<34x816xf32, #tpu.memory_space<vmem>>, %arg3: memref<1x34xf32, #tpu.memory_space<vmem>>, %arg4: memref<1x34xf32, #tpu.memory_space<vmem>>) attributes {dimension_semantics = [#tpu.dimension_semantics<parallel>], iteration_bounds = array<i64: 1>, scalar_prefetch = 0 : i64, scratch_operands = 0 : i64, tpu.core_type = #tpu.core_type<tc>, window_params = [{transform_indices = @transform_0, window_bounds = array<i64: 1, 816, 196>}, {pipeline_mode = #tpu.pipeline_mode<synchronous>, transform_indices = @transform_1, window_bounds = array<i64: 34, 816>}, {pipeline_mode = #tpu.pipeline_mode<synchronous>, transform_indices = @transform_2, window_bounds = array<i64: 1, 34>}, {transform_indices = @transform_3, window_bounds = array<i64: 1, 34>}]} {
    %c0 = arith.constant 0 : index
    %c0_0 = arith.constant 0 : index
    %0 = vector.load %arg2[%c0, %c0_0] : memref<34x816xf32, #tpu.memory_space<vmem>>, vector<34x816xf32>
    %c0_1 = arith.constant 0 : index
    %c0_2 = arith.constant 0 : index
    %1 = vector.load %arg3[%c0_1, %c0_2] : memref<1x34xf32, #tpu.memory_space<vmem>>, vector<1x34xf32>
    %c0_3 = arith.constant 0 : index
    %c0_4 = arith.constant 0 : index
    %c0_5 = arith.constant 0 : index
    %2 = vector.load %arg1[%c0_3, %c0_4, %c0_5] : memref<1x816x196xf32, #tpu.memory_space<vmem>>, vector<1x816x196xf32>
    %3 = vector.shape_cast %2 : vector<1x816x196xf32> to vector<816x196xf32>
    %cst = arith.constant dense<0.000000e+00> : vector<34x196xf32>
    %4 = tpu.matmul %0, %3, %cst {dimension_numbers = #tpu.dot_dimension_numbers<[1], [0], [0], [1], [0, 0, 1, 1], [], []>} : vector<34x816xf32>, vector<816x196xf32>, vector<34x196xf32> -> vector<34x196xf32>
    %cst_6 = arith.constant dense<0.000000e+00> : vector<34xf32>
    %5 = vector.multi_reduction <add>, %4, %cst_6 [1] : vector<34x196xf32> to vector<34xf32>
    %6 = vector.shape_cast %5 : vector<34xf32> to vector<34x1xf32>
    %7 = tpu.transpose %6, [1, 0] : vector<34x1xf32> -> vector<1x34xf32>
    %cst_7 = arith.constant 0.00510204071 : f32
    %8 = vector.broadcast %cst_7 : f32 to vector<1x34xf32>
    %9 = arith.mulf %7, %8 : vector<1x34xf32>
    %10 = arith.addf %9, %1 : vector<1x34xf32>
    %c0_8 = arith.constant 0 : index
    %c0_9 = arith.constant 0 : index
    %11 = vector.load %arg4[%c0_8, %c0_9] : memref<1x34xf32, #tpu.memory_space<vmem>>, vector<1x34xf32>
    tpu.vector_store %arg4[%c0_8, %c0_9], %10 {strides = array<i32>} : memref<1x34xf32, #tpu.memory_space<vmem>>, vector<1x34xf32>,
    return
  }
  func.func @transform_0(%arg0: i32) -> (i32, i32, i32) {
    %c0_i32 = arith.constant 0 : i32
    %c0_i32_0 = arith.constant 0 : i32
    %c0_i32_1 = arith.constant 0 : i32
    return %arg0, %c0_i32, %c0_i32_0 : i32, i32, i32
  }
  func.func @transform_1(%arg0: i32) -> (i32, i32) {
    %c0_i32 = arith.constant 0 : i32
    %c0_i32_0 = arith.constant 0 : i32
    %c0_i32_1 = arith.constant 0 : i32
    return %c0_i32, %c0_i32_0 : i32, i32
  }
  func.func @transform_2(%arg0: i32) -> (i32, i32) {
    %c0_i32 = arith.constant 0 : i32
    %c0_i32_0 = arith.constant 0 : i32
    %c0_i32_1 = arith.constant 0 : i32
    return %c0_i32, %c0_i32_0 : i32, i32
  }
  func.func @transform_3(%arg0: i32) -> (i32, i32) {
    %c0_i32 = arith.constant 0 : i32
    %c0_i32_0 = arith.constant 0 : i32
    return %arg0, %c0_i32 : i32, i32
  }
}

</mosaic_0001>

<bundles_post_ra>
// kernel: mean_conv1x1.1
= control target key start
LH: loop header
LB: loop body
LE: loop exit
PB: predicated region body
PF: predicated region fallthrough
CT: control target
= control target key end

     0   :  { %s1753_s0 = inlined_call_operand.vmem [shape: f32[1,816,196], index: 0, kind: input, shape index: {}]   ;;  %s1754_s1 = inlined_call_operand.vmem [shape: f32[34,816], index: 1, kind: input, shape index: {}]   ;;  %s1755_s2 = inlined_call_operand.vmem [shape: f32[1,34], index: 2, kind: input, shape index: {}]   ;;  %s1756_s3 = inlined_call_operand.hbm [shape: f32[1,34], index: 3, kind: output, shape index: {}]  }
   0x1   :  { %v52_v0 = vld [vmem:[%s1753_s0 + $0x8] sm:$0xff]  ;;  %v54_v1 = vld [vmem:[%s1753_s0 + $0x18] sm:$0xff]  ;;  %v51_v2 = vld [vmem:[%s1753_s0] sm:$0xff] }
   0x2   :  { %v730_v3 = vpack.c.bf16 %v54_v1, %v52_v0  ;;  %v53_v4 = vld [vmem:[%s1753_s0 + $0x10] sm:$0xff]  ;;  %v56_v5 = vld [vmem:[%s1753_s0 + $0x28] sm:$0xff]  ;;  %v58_v6 = vld [vmem:[%s1753_s0 + $0x38] sm:$0xff] }
   0x3   :  { %v732_v7 = vpack.c.bf16 %v53_v4, %v51_v2  ;;  %v734_v8 = vpack.c.bf16 %v58_v6, %v56_v5  ;;  %v55_v9 = vld [vmem:[%s1753_s0 + $0x20] sm:$0xff]  ;;  %v57_v10 = vld [vmem:[%s1753_s0 + $0x30] sm:$0xff]  ;;  %v60_v11 = vld [vmem:[%s1753_s0 + $0x48] sm:$0xff] }
   0x4   :  { %731 = vmatprep.subr.bf16.mxu1 %v730_v3  ;;  %v62_v12 = vld [vmem:[%s1753_s0 + $0x58] sm:$0xff]  ;;  %v736_v13 = vpack.c.bf16 %v57_v10, %v55_v9  ;;  %v59_v15 = vld [vmem:[%s1753_s0 + $0x40] sm:$0xff]  ;;  %v61_v16 = vld [vmem:[%s1753_s0 + $0x50] sm:$0xff] }
   0x5   :  { %733 = vmatpush1.bf16.msra.mxu1 %v732_v7  ;;  %v738_v14 = vpack.c.bf16 %v62_v12, %v60_v11  ;;  %v64_v17 = vld [vmem:[%s1753_s0 + $0x68] sm:$0xff]  ;;  %v66_v18 = vld [vmem:[%s1753_s0 + $0x78] sm:$0xff]  ;;  %v740_v19 = vpack.c.bf16 %v61_v16, %v59_v15  ;;  %v63_v20 = vld [vmem:[%s1753_s0 + $0x60] sm:$0xff] }
   0x6   :  { %735 = vmatprep.subr.bf16.mxu1 %v734_v8  ;;  %v180_v21 = vld [vmem:[%s1753_s0 + $0x408] sm:$0xff]  ;;  %v182_v22 = vld [vmem:[%s1753_s0 + $0x418] sm:$0xff]  ;;  %v742_v23 = vpack.c.bf16 %v66_v18, %v64_v17  ;;  %v65_v24 = vld [vmem:[%s1753_s0 + $0x70] sm:$0xff] }
   0x7   :  { %v858_v25 = vpack.c.bf16 %v182_v22, %v180_v21  ;;  %v179_v26 = vld [vmem:[%s1753_s0 + $0x400] sm:$0xff]  ;;  %v181_v27 = vld [vmem:[%s1753_s0 + $0x410] sm:$0xff]  ;;  %v68_v28 = vld [vmem:[%s1753_s0 + $0x88] sm:$0xff]  ;;  %v744_v33 = vpack.c.bf16 %v65_v24, %v63_v20 }
   0x8   :  { %v70_v29 = vld [vmem:[%s1753_s0 + $0x98] sm:$0xff]  ;;  %v860_v30 = vpack.c.bf16 %v181_v27, %v179_v26  ;;  %v184_v31 = vld [vmem:[%s1753_s0 + $0x428] sm:$0xff]  ;;  %v67_v34 = vld [vmem:[%s1753_s0 + $0x80] sm:$0xff] }
   0x9   :  { %737 = vmatpush1.bf16.msra.mxu1 %v736_v13  ;;  %859 = vmatprep.subr.bf16.mxu0 %v858_v25  ;;  %v186_v32 = vld [vmem:[%s1753_s0 + $0x438] sm:$0xff]  ;;  %v183_v36 = vld [vmem:[%s1753_s0 + $0x420] sm:$0xff]  ;;  %v185_v37 = vld [vmem:[%s1753_s0 + $0x430] sm:$0xff]  ;;  %v746_v38 = vpack.c.bf16 %v70_v29, %v68_v28 }
   0xa   :  { %739 = vmatprep.subr.bf16.mxu1 %v738_v14  ;;  %861 = vmatpush1.bf16.msra.mxu0 %v860_v30  ;;  %v862_v35 = vpack.c.bf16 %v186_v32, %v184_v31  ;;  %v69_v39 = vld [vmem:[%s1753_s0 + $0x90] sm:$0xff]  ;;  %v864_v40 = vpack.c.bf16 %v185_v37, %v183_v36  ;;  %v188_v41 = vld [vmem:[%s1753_s0 + $0x448] sm:$0xff]  ;;  %v190_v42 = vld [vmem:[%s1753_s0 + $0x458] sm:$0xff] }
   0xb   :  { %v72_v43 = vld [vmem:[%s1753_s0 + $0xa8] sm:$0xff]  ;;  %v74_v44 = vld [vmem:[%s1753_s0 + $0xb8] sm:$0xff]  ;;  %v866_v45 = vpack.c.bf16 %v190_v42, %v188_v41  ;;  %v187_v46 = vld [vmem:[%s1753_s0 + $0x440] sm:$0xff]  ;;  %v748_v48 = vpack.c.bf16 %v69_v39, %v67_v34 }
   0xc   :  { %863 = vmatprep.subr.bf16.mxu0 %v862_v35  ;;  %v189_v47 = vld [vmem:[%s1753_s0 + $0x450] sm:$0xff]  ;;  %v71_v49 = vld [vmem:[%s1753_s0 + $0xa0] sm:$0xff]  ;;  %v192_v51 = vld [vmem:[%s1753_s0 + $0x468] sm:$0xff]  ;;  %v750_v53 = vpack.c.bf16 %v74_v44, %v72_v43 }
   0xd   :  { %741 = vmatpush1.bf16.msra.mxu1 %v740_v19  ;;  %v868_v50 = vpack.c.bf16 %v189_v47, %v187_v46  ;;  %v194_v52 = vld [vmem:[%s1753_s0 + $0x478] sm:$0xff]  ;;  %v73_v54 = vld [vmem:[%s1753_s0 + $0xb0] sm:$0xff]  ;;  %v191_v56 = vld [vmem:[%s1753_s0 + $0x460] sm:$0xff] }
   0xe   :  { %743 = vmatprep.subr.bf16.mxu1 %v742_v23  ;;  %865 = vmatpush1.bf16.msra.mxu0 %v864_v40  ;;  %v870_v55 = vpack.c.bf16 %v194_v52, %v192_v51  ;;  %v193_v57 = vld [vmem:[%s1753_s0 + $0x470] sm:$0xff]  ;;  %v76_v58 = vld [vmem:[%s1753_s0 + $0xc8] sm:$0xff]  ;;  %v78_v59 = vld [vmem:[%s1753_s0 + $0xd8] sm:$0xff]  ;;  %v752_v62 = vpack.c.bf16 %v73_v54, %v71_v49 }
   0xf   :  { %867 = vmatprep.subr.bf16.mxu0 %v866_v45  ;;  %v196_v60 = vld [vmem:[%s1753_s0 + $0x488] sm:$0xff]  ;;  %v198_v61 = vld [vmem:[%s1753_s0 + $0x498] sm:$0xff]  ;;  %v75_v63 = vld [vmem:[%s1753_s0 + $0xc0] sm:$0xff]  ;;  %v872_v1 = vpack.c.bf16 %v193_v57, %v191_v56  ;;  %v754_v2 = vpack.c.bf16 %v78_v59, %v76_v58 }
  0x10   :  { %v77_v0 = vld [vmem:[%s1753_s0 + $0xd0] sm:$0xff]  ;;  %v80_v3 = vld [vmem:[%s1753_s0 + $0xe8] sm:$0xff]  ;;  %v874_v4 = vpack.c.bf16 %v198_v61, %v196_v60  ;;  %v195_v5 = vld [vmem:[%s1753_s0 + $0x480] sm:$0xff] }
  0x11   :  { %745 = vmatpush1.bf16.msra.mxu1 %v744_v33  ;;  %v197_v6 = vld [vmem:[%s1753_s0 + $0x490] sm:$0xff]  ;;  %v82_v7 = vld [vmem:[%s1753_s0 + $0xf8] sm:$0xff]  ;;  %v200_v8 = vld [vmem:[%s1753_s0 + $0x4a8] sm:$0xff]  ;;  %v756_v10 = vpack.c.bf16 %v77_v0, %v75_v63 }
  0x12   :  { %747 = vmatprep.subr.bf16.mxu1 %v746_v38  ;;  %869 = vmatpush1.bf16.msra.mxu0 %v868_v50  ;;  %v202_v9 = vld [vmem:[%s1753_s0 + $0x4b8] sm:$0xff]  ;;  %v79_v11 = vld [vmem:[%s1753_s0 + $0xe0] sm:$0xff]  ;;  %v81_v12 = vld [vmem:[%s1753_s0 + $0xf0] sm:$0xff]  ;;  %v876_v13 = vpack.c.bf16 %v197_v6, %v195_v5  ;;  %v758_v14 = vpack.c.bf16 %v82_v7, %v80_v3 }
  0x13   :  { %871 = vmatprep.subr.bf16.mxu0 %v870_v55  ;;  %v84_v15 = vld [vmem:[%s1753_s0 + $0x108] sm:$0xff]  ;;  %v878_v16 = vpack.c.bf16 %v202_v9, %v200_v8  ;;  %v199_v17 = vld [vmem:[%s1753_s0 + $0x4a0] sm:$0xff]  ;;  %v201_v18 = vld [vmem:[%s1753_s0 + $0x4b0] sm:$0xff]  ;;  %v760_v22 = vpack.c.bf16 %v81_v12, %v79_v11 }
  0x14   :  { %v86_v19 = vld [vmem:[%s1753_s0 + $0x118] sm:$0xff]  ;;  %v204_v20 = vld [vmem:[%s1753_s0 + $0x4c8] sm:$0xff]  ;;  %v83_v23 = vld [vmem:[%s1753_s0 + $0x100] sm:$0xff]  ;;  %v880_v25 = vpack.c.bf16 %v201_v18, %v199_v17 }
  0x15   :  { %749 = vmatpush1.bf16.msra.mxu1 %v748_v48  ;;  %v206_v21 = vld [vmem:[%s1753_s0 + $0x4d8] sm:$0xff]  ;;  %v85_v24 = vld [vmem:[%s1753_s0 + $0x110] sm:$0xff]  ;;  %v762_v26 = vpack.c.bf16 %v86_v19, %v84_v15  ;;  %v88_v27 = vld [vmem:[%s1753_s0 + $0x128] sm:$0xff] }
  0x16   :  { %751 = vmatprep.subr.bf16.mxu1 %v750_v53  ;;  %873 = vmatpush1.bf16.msra.mxu0 %v872_v1  ;;  %v882_v28 = vpack.c.bf16 %v206_v21, %v204_v20  ;;  %v203_v29 = vld [vmem:[%s1753_s0 + $0x4c0] sm:$0xff]  ;;  %v205_v30 = vld [vmem:[%s1753_s0 + $0x4d0] sm:$0xff]  ;;  %v90_v31 = vld [vmem:[%s1753_s0 + $0x138] sm:$0xff]  ;;  %v764_v34 = vpack.c.bf16 %v85_v24, %v83_v23 }
  0x17   :  { %875 = vmatprep.subr.bf16.mxu0 %v874_v4  ;;  %v208_v32 = vld [vmem:[%s1753_s0 + $0x4e8] sm:$0xff]  ;;  %v210_v33 = vld [vmem:[%s1753_s0 + $0x4f8] sm:$0xff]  ;;  %v87_v35 = vld [vmem:[%s1753_s0 + $0x120] sm:$0xff]  ;;  %v884_v37 = vpack.c.bf16 %v205_v30, %v203_v29  ;;  %v766_v38 = vpack.c.bf16 %v90_v31, %v88_v27 }
  0x18   :  { %v89_v36 = vld [vmem:[%s1753_s0 + $0x130] sm:$0xff]  ;;  %v92_v39 = vld [vmem:[%s1753_s0 + $0x148] sm:$0xff]  ;;  %v886_v40 = vpack.c.bf16 %v210_v33, %v208_v32  ;;  %v207_v41 = vld [vmem:[%s1753_s0 + $0x4e0] sm:$0xff] }
  0x19   :  { %753 = vmatpush1.bf16.msra.mxu1 %v752_v62  ;;  %v209_v42 = vld [vmem:[%s1753_s0 + $0x4f0] sm:$0xff]  ;;  %v94_v43 = vld [vmem:[%s1753_s0 + $0x158] sm:$0xff]  ;;  %v212_v44 = vld [vmem:[%s1753_s0 + $0x508] sm:$0xff]  ;;  %v768_v47 = vpack.c.bf16 %v89_v36, %v87_v35 }
  0x1a   :  { %755 = vmatprep.subr.bf16.mxu1 %v754_v2  ;;  %877 = vmatpush1.bf16.msra.mxu0 %v876_v13  ;;  %v214_v45 = vld [vmem:[%s1753_s0 + $0x518] sm:$0xff]  ;;  %v16_v46 = vld [vmem:[%s1754_s1 + $0x8] sm:$0xff]  ;;  %v91_v48 = vld [vmem:[%s1753_s0 + $0x140] sm:$0xff]  ;;  %v888_v50 = vpack.c.bf16 %v209_v42, %v207_v41  ;;  %v770_v51 = vpack.c.bf16 %v94_v43, %v92_v39 }
  0x1b   :  { %879 = vmatprep.subr.bf16.mxu0 %v878_v16  ;;  %v93_v49 = vld [vmem:[%s1753_s0 + $0x150] sm:$0xff]  ;;  %v96_v52 = vld [vmem:[%s1753_s0 + $0x168] sm:$0xff]  ;;  %v890_v53 = vpack.c.bf16 %v214_v45, %v212_v44  ;;  %v211_v54 = vld [vmem:[%s1753_s0 + $0x500] sm:$0xff]  ;;  %335 = vmatprep.mubr.f32.mxu1 %v16_v46 }
  0x1c   :  { %v213_v55 = vld [vmem:[%s1753_s0 + $0x510] sm:$0xff]  ;;  %v98_v56 = vld [vmem:[%s1753_s0 + $0x178] sm:$0xff]  ;;  %v216_v57 = vld [vmem:[%s1753_s0 + $0x528] sm:$0xff]  ;;  %v772_v59 = vpack.c.bf16 %v93_v49, %v91_v48 }
  0x1d   :  { %757 = vmatpush1.bf16.msra.mxu1 %v756_v10  ;;  %v218_v58 = vld [vmem:[%s1753_s0 + $0x538] sm:$0xff]  ;;  %v95_v60 = vld [vmem:[%s1753_s0 + $0x160] sm:$0xff]  ;;  %v97_v61 = vld [vmem:[%s1753_s0 + $0x170] sm:$0xff]  ;;  %v892_v62 = vpack.c.bf16 %v213_v55, %v211_v54  ;;  %v774_v63 = vpack.c.bf16 %v98_v56, %v96_v52 }
  0x1e   :  { %759 = vmatprep.subr.bf16.mxu1 %v758_v14  ;;  %881 = vmatpush1.bf16.msra.mxu0 %v880_v25  ;;  %v100_v0 = vld [vmem:[%s1753_s0 + $0x188] sm:$0xff]  ;;  %v894_v1 = vpack.c.bf16 %v218_v58, %v216_v57  ;;  %v215_v2 = vld [vmem:[%s1753_s0 + $0x520] sm:$0xff]  ;;  %v217_v3 = vld [vmem:[%s1753_s0 + $0x530] sm:$0xff]  ;;  %v776_v7 = vpack.c.bf16 %v97_v61, %v95_v60 }
  0x1f   :  { %883 = vmatprep.subr.bf16.mxu0 %v882_v28  ;;  %v102_v4 = vld [vmem:[%s1753_s0 + $0x198] sm:$0xff]  ;;  %v220_v5 = vld [vmem:[%s1753_s0 + $0x548] sm:$0xff]  ;;  %v99_v8 = vld [vmem:[%s1753_s0 + $0x180] sm:$0xff]  ;;  %v896_v10 = vpack.c.bf16 %v217_v3, %v215_v2 }
  0x20   :  { %v222_v6 = vld [vmem:[%s1753_s0 + $0x558] sm:$0xff]  ;;  %v101_v9 = vld [vmem:[%s1753_s0 + $0x190] sm:$0xff]  ;;  %v778_v11 = vpack.c.bf16 %v102_v4, %v100_v0  ;;  %v104_v12 = vld [vmem:[%s1753_s0 + $0x1a8] sm:$0xff] }
  0x21   :  { %761 = vmatpush1.bf16.msra.mxu1 %v760_v22  ;;  %v898_v13 = vpack.c.bf16 %v222_v6, %v220_v5  ;;  %v219_v14 = vld [vmem:[%s1753_s0 + $0x540] sm:$0xff]  ;;  %v221_v15 = vld [vmem:[%s1753_s0 + $0x550] sm:$0xff]  ;;  %v106_v16 = vld [vmem:[%s1753_s0 + $0x1b8] sm:$0xff]  ;;  %v780_v19 = vpack.c.bf16 %v101_v9, %v99_v8 }
  0x22   :  { %763 = vmatprep.subr.bf16.mxu1 %v762_v26  ;;  %885 = vmatpush1.bf16.msra.mxu0 %v884_v37  ;;  %v224_v17 = vld [vmem:[%s1753_s0 + $0x568] sm:$0xff]  ;;  %v226_v18 = vld [vmem:[%s1753_s0 + $0x578] sm:$0xff]  ;;  %v103_v20 = vld [vmem:[%s1753_s0 + $0x1a0] sm:$0xff]  ;;  %v900_v22 = vpack.c.bf16 %v221_v15, %v219_v14  ;;  %v782_v23 = vpack.c.bf16 %v106_v16, %v104_v12 }
  0x23   :  { %887 = vmatprep.subr.bf16.mxu0 %v886_v40  ;;  %v105_v21 = vld [vmem:[%s1753_s0 + $0x1b0] sm:$0xff]  ;;  %v108_v24 = vld [vmem:[%s1753_s0 + $0x1c8] sm:$0xff]  ;;  %v902_v25 = vpack.c.bf16 %v226_v18, %v224_v17  ;;  %v223_v26 = vld [vmem:[%s1753_s0 + $0x560] sm:$0xff] }
  0x24   :  { %v225_v27 = vld [vmem:[%s1753_s0 + $0x570] sm:$0xff]  ;;  %v110_v28 = vld [vmem:[%s1753_s0 + $0x1d8] sm:$0xff]  ;;  %v228_v29 = vld [vmem:[%s1753_s0 + $0x588] sm:$0xff]  ;;  %v784_v32 = vpack.c.bf16 %v105_v21, %v103_v20 }
  0x25   :  { %765 = vmatpush1.bf16.msra.mxu1 %v764_v34  ;;  %v230_v30 = vld [vmem:[%s1753_s0 + $0x598] sm:$0xff]  ;;  %v20_v31 = vld [vmem:[%s1754_s1 + $0x28] sm:$0xff]  ;;  %v107_v33 = vld [vmem:[%s1753_s0 + $0x1c0] sm:$0xff]  ;;  %v904_v35 = vpack.c.bf16 %v225_v27, %v223_v26  ;;  %v786_v36 = vpack.c.bf16 %v110_v28, %v108_v24 }
  0x26   :  { %767 = vmatprep.subr.bf16.mxu1 %v766_v38  ;;  %889 = vmatpush1.bf16.msra.mxu0 %v888_v50  ;;  %v109_v34 = vld [vmem:[%s1753_s0 + $0x1d0] sm:$0xff]  ;;  %v112_v37 = vld [vmem:[%s1753_s0 + $0x1e8] sm:$0xff]  ;;  %v906_v38 = vpack.c.bf16 %v230_v30, %v228_v29  ;;  %v227_v39 = vld [vmem:[%s1753_s0 + $0x580] sm:$0xff] }
  0x27   :  { %891 = vmatprep.subr.bf16.mxu0 %v890_v53  ;;  %v229_v40 = vld [vmem:[%s1753_s0 + $0x590] sm:$0xff]  ;;  %v114_v41 = vld [vmem:[%s1753_s0 + $0x1f8] sm:$0xff]  ;;  %v232_v42 = vld [vmem:[%s1753_s0 + $0x5a8] sm:$0xff]  ;;  %525 = vmatprep.mubr.f32.mxu0 %v20_v31  ;;  %v788_v44 = vpack.c.bf16 %v109_v34, %v107_v33 }
  0x28   :  { %v234_v43 = vld [vmem:[%s1753_s0 + $0x5b8] sm:$0xff]  ;;  %v111_v45 = vld [vmem:[%s1753_s0 + $0x1e0] sm:$0xff]  ;;  %v113_v46 = vld [vmem:[%s1753_s0 + $0x1f0] sm:$0xff]  ;;  %v790_v48 = vpack.c.bf16 %v114_v41, %v112_v37 }
  0x29   :  { %769 = vmatpush1.bf16.msra.mxu1 %v768_v47  ;;  %v908_v47 = vpack.c.bf16 %v229_v40, %v227_v39  ;;  %v116_v49 = vld [vmem:[%s1753_s0 + $0x208] sm:$0xff]  ;;  %v910_v50 = vpack.c.bf16 %v234_v43, %v232_v42  ;;  %v233_v52 = vld [vmem:[%s1753_s0 + $0x5b0] sm:$0xff]  ;;  %v118_v53 = vld [vmem:[%s1753_s0 + $0x218] sm:$0xff]  ;;  %v792_v56 = vpack.c.bf16 %v113_v46, %v111_v45 }
  0x2a   :  { %771 = vmatprep.subr.bf16.mxu1 %v770_v51  ;;  %893 = vmatpush1.bf16.msra.mxu0 %v892_v62  ;;  %v231_v51 = vld [vmem:[%s1753_s0 + $0x5a0] sm:$0xff]  ;;  %v236_v54 = vld [vmem:[%s1753_s0 + $0x5c8] sm:$0xff]  ;;  %v238_v55 = vld [vmem:[%s1753_s0 + $0x5d8] sm:$0xff]  ;;  %v794_v60 = vpack.c.bf16 %v118_v53, %v116_v49 }
  0x2b   :  { %895 = vmatprep.subr.bf16.mxu0 %v894_v1  ;;  %v115_v57 = vld [vmem:[%s1753_s0 + $0x200] sm:$0xff]  ;;  %v117_v58 = vld [vmem:[%s1753_s0 + $0x210] sm:$0xff]  ;;  %v120_v61 = vld [vmem:[%s1753_s0 + $0x228] sm:$0xff]  ;;  %v914_v62 = vpack.c.bf16 %v238_v55, %v236_v54 }
  0x2c   :  { %v237_v0 = vld [vmem:[%s1753_s0 + $0x5d0] sm:$0xff]  ;;  %v122_v1 = vld [vmem:[%s1753_s0 + $0x238] sm:$0xff]  ;;  %v240_v2 = vld [vmem:[%s1753_s0 + $0x5e8] sm:$0xff]  ;;  %v796_v5 = vpack.c.bf16 %v117_v58, %v115_v57 }
  0x2d   :  { %773 = vmatpush1.bf16.msra.mxu1 %v772_v59  ;;  %v912_v59 = vpack.c.bf16 %v233_v52, %v231_v51  ;;  %v242_v3 = vld [vmem:[%s1753_s0 + $0x5f8] sm:$0xff]  ;;  %v15_v4 = vld [vmem:[%s1754_s1] sm:$0xff]  ;;  %v798_v9 = vpack.c.bf16 %v122_v1, %v120_v61  ;;  %v244_v15 = vld [vmem:[%s1753_s0 + $0x608] sm:$0xff] }
  0x2e   :  { %775 = vmatprep.subr.bf16.mxu1 %v774_v63  ;;  %897 = vmatpush1.bf16.msra.mxu0 %v896_v10  ;;  %v235_v63 = vld [vmem:[%s1753_s0 + $0x5c0] sm:$0xff]  ;;  %v124_v10 = vld [vmem:[%s1753_s0 + $0x248] sm:$0xff]  ;;  %v126_v14 = vld [vmem:[%s1753_s0 + $0x258] sm:$0xff] }
  0x2f   :  { %899 = vmatprep.subr.bf16.mxu0 %v898_v13  ;;  %v119_v6 = vld [vmem:[%s1753_s0 + $0x220] sm:$0xff]  ;;  %v916_v8 = vpack.c.bf16 %v237_v0, %v235_v63  ;;  %v241_v13 = vld [vmem:[%s1753_s0 + $0x5f0] sm:$0xff]  ;;  %v246_v16 = vld [vmem:[%s1753_s0 + $0x618] sm:$0xff]  ;;  %v802_v21 = vpack.c.bf16 %v126_v14, %v124_v10 }
  0x30   :  { %v239_v12 = vld [vmem:[%s1753_s0 + $0x5e0] sm:$0xff]  ;;  %v22_v20 = vld [vmem:[%s1754_s1 + $0x38] sm:$0xff]  ;;  %v128_v24 = vld [vmem:[%s1753_s0 + $0x268] sm:$0xff] }
  0x31   :  { %777 = vmatpush1.bf16.msra.mxu1 %v776_v7  ;;  %v121_v7 = vld [vmem:[%s1753_s0 + $0x230] sm:$0xff]  ;;  %v23_v17 = vld [vmem:[%s1754_s1 + $0x40] sm:$0xff]  ;;  %v130_v26 = vld [vmem:[%s1753_s0 + $0x278] sm:$0xff] }
  0x32   :  { %779 = vmatprep.subr.bf16.mxu1 %v778_v11  ;;  %901 = vmatpush1.bf16.msra.mxu0 %v900_v22  ;;  %v918_v11 = vpack.c.bf16 %v242_v3, %v240_v2  ;;  %v800_v18 = vpack.c.bf16 %v121_v7, %v119_v6  ;;  %v123_v22 = vld [vmem:[%s1753_s0 + $0x240] sm:$0xff]  ;;  %v245_v28 = vld [vmem:[%s1753_s0 + $0x610] sm:$0xff]  ;;  %v248_v29 = vld [vmem:[%s1753_s0 + $0x628] sm:$0xff] }
  0x33   :  { %903 = vmatprep.subr.bf16.mxu0 %v902_v25  ;;  %v922_v25 = vpack.c.bf16 %v246_v16, %v244_v15  ;;  %v243_v27 = vld [vmem:[%s1753_s0 + $0x600] sm:$0xff]  ;;  %v250_v30 = vld [vmem:[%s1753_s0 + $0x638] sm:$0xff]  ;;  %v129_v37 = vld [vmem:[%s1753_s0 + $0x270] sm:$0xff] }
  0x34   :  { %v30_v31 = vld [vmem:[%s1754_s1 + $0x78] sm:$0xff]  ;;  %v127_v33 = vld [vmem:[%s1753_s0 + $0x260] sm:$0xff]  ;;  %v924_v40 = vpack.c.bf16 %v245_v28, %v243_v27  ;;  %v926_v42 = vpack.c.bf16 %v250_v30, %v248_v29  ;;  %v252_v45 = vld [vmem:[%s1753_s0 + $0x648] sm:$0xff] }
  0x35   :  { %781 = vmatpush1.bf16.msra.mxu1 %v780_v19  ;;  %v920_v19 = vpack.c.bf16 %v241_v13, %v239_v12  ;;  %v19_v34 = vld [vmem:[%s1754_s1 + $0x20] sm:$0xff]  ;;  %v134_v41 = vld [vmem:[%s1753_s0 + $0x298] sm:$0xff]  ;;  %v36_v51 = vld [vmem:[%s1754_s1 + $0xa8] sm:$0xff] }
  0x36   :  { %783 = vmatprep.subr.bf16.mxu1 %v782_v23  ;;  %905 = vmatpush1.bf16.msra.mxu0 %v904_v35  ;;  %v125_v23 = vld [vmem:[%s1753_s0 + $0x250] sm:$0xff]  ;;  %v27_v39 = vld [vmem:[%s1754_s1 + $0x60] sm:$0xff]  ;;  %v254_v46 = vld [vmem:[%s1753_s0 + $0x658] sm:$0xff] }
  0x37   :  { %907 = vmatprep.subr.bf16.mxu0 %v906_v38  ;;  %v29_v35 = vld [vmem:[%s1754_s1 + $0x70] sm:$0xff]  ;;  %v132_v38 = vld [vmem:[%s1753_s0 + $0x288] sm:$0xff]  ;;  %v247_v43 = vld [vmem:[%s1753_s0 + $0x620] sm:$0xff]  ;;  %v930_v58 = vpack.c.bf16 %v254_v46, %v252_v45 }
  0x38   :  { %v131_v49 = vld [vmem:[%s1753_s0 + $0x280] sm:$0xff]  ;;  %v810_v52 = vpack.c.bf16 %v134_v41, %v132_v38  ;;  %v133_v53 = vld [vmem:[%s1753_s0 + $0x290] sm:$0xff]  ;;  %v136_v54 = vld [vmem:[%s1753_s0 + $0x2a8] sm:$0xff] }
  0x39   :  { %785 = vmatpush1.bf16.msra.mxu1 %v784_v32  ;;  %v804_v32 = vpack.c.bf16 %v125_v23, %v123_v22  ;;  %v34_v55 = vld [vmem:[%s1754_s1 + $0x98] sm:$0xff]  ;;  %v44_v61 = vld [vmem:[%s1754_s1 + $0xe8] sm:$0x3] }
  0x3a   :  { %787 = vmatprep.subr.bf16.mxu1 %v786_v36  ;;  %909 = vmatpush1.bf16.msra.mxu0 %v908_v47  ;;  %v806_v36 = vpack.c.bf16 %v130_v26, %v128_v24  ;;  %v37_v47 = vld [vmem:[%s1754_s1 + $0xb0] sm:$0xff]  ;;  %v138_v57 = vld [vmem:[%s1753_s0 + $0x2b8] sm:$0xff] }
  0x3b   :  { %911 = vmatprep.subr.bf16.mxu0 %v910_v50  ;;  %v26_v50 = vld [vmem:[%s1754_s1 + $0x58] sm:$0xff] }
  0x3d   :  { %789 = vmatpush1.bf16.msra.mxu1 %v788_v44  ;;  %v249_v44 = vld [vmem:[%s1753_s0 + $0x630] sm:$0xff] }
  0x3e   :  { %791 = vmatprep.subr.bf16.mxu1 %v790_v48  ;;  %913 = vmatpush1.bf16.msra.mxu0 %v912_v59  ;;  %v808_v48 = vpack.c.bf16 %v129_v37, %v127_v33  ;;  %v251_v59 = vld [vmem:[%s1753_s0 + $0x640] sm:$0xff] }
  0x3f   :  { %915 = vmatprep.subr.bf16.mxu0 %v914_v62 }
  0x41   :  { %793 = vmatpush1.bf16.msra.mxu1 %v792_v56  ;;  %v928_v56 = vpack.c.bf16 %v249_v44, %v247_v43 }
  0x42   :  { %795 = vmatprep.subr.bf16.mxu1 %v794_v60  ;;  %917 = vmatpush1.bf16.msra.mxu0 %v916_v8  ;;  %v253_v60 = vld [vmem:[%s1753_s0 + $0x650] sm:$0xff] }
  0x43   :  { %919 = vmatprep.subr.bf16.mxu0 %v918_v11 }
  0x44   :  { %336 = vmatmul.mubr.f32.vlgmr.msra.gmra.mrb[0].mxu1 %v15_v4 }
  0x45   :  { %797 = vmatpush1.bf16.msra.mxu1 %v796_v5  ;;  %341 = vmatprep.mubr.f32.mxu1 %v23_v17 }
  0x46   :  { %799 = vmatprep.subr.bf16.mxu1 %v798_v9  ;;  %921 = vmatpush1.bf16.msra.mxu0 %v920_v19 }
  0x47   :  { %923 = vmatprep.subr.bf16.mxu0 %v922_v25 }
  0x48   :  { %342 = vmatmul.mubr.f32.gmra.mrb[2].mxu1 %v22_v20 }
  0x49   :  { %801 = vmatpush1.bf16.msra.mxu1 %v800_v18  ;;  %347 = vmatprep.mubr.f32.mxu1 %v30_v31 }
  0x4a   :  { %803 = vmatprep.subr.bf16.mxu1 %v802_v21  ;;  %526 = vmatmul.mubr.f32.vlgmr.msra.gmra.mrb[0].mxu0 %v19_v34 }
  0x4b   :  { %531 = vmatprep.mubr.f32.mxu0 %v27_v39  ;;  %925 = vmatpush1.bf16.msra.mxu0 %v924_v40 }
  0x4c   :  { %348 = vmatmul.mubr.f32.gmra.mrb[4].mxu1 %v29_v35  ;;  %927 = vmatprep.subr.bf16.mxu0 %v926_v42 }
  0x4d   :  { %805 = vmatpush1.bf16.msra.mxu1 %v804_v32  ;;  %353 = vmatprep.mubr.f32.mxu1 %v37_v47 }
  0x4e   :  { %807 = vmatprep.subr.bf16.mxu1 %v806_v36  ;;  %532 = vmatmul.mubr.f32.gmra.mrb[2].mxu0 %v26_v50 }
  0x50   :  { %354 = vmatmul.mubr.f32.gmra.mrb[6].mxu1 %v36_v51 }
  0x51   :  { %8 = vsyncpa [#allocation3], 0  ;;  %809 = vmatpush1.bf16.msra.mxu1 %v808_v48  ;;  %v812_v62 = vpack.c.bf16 %v133_v53, %v131_v49  ;;  %537 = vmatprep.mubr.f32.mxu0 %v34_v55  ;;  %v33_v63 = vld [vmem:[%s1754_s1 + $0x90] sm:$0xff]  ;;  %v43_v0 = vld [vmem:[%s1754_s1 + $0xe0] sm:$0x3]  ;;  %v814_v1 = vpack.c.bf16 %v138_v57, %v136_v54  ;;  %v932_v5 = vpack.c.bf16 %v253_v60, %v251_v59  ;;  %v990_v25 = vmov 0.0  }
  0x52   :  { %811 = vmatprep.subr.bf16.mxu1 %v810_v52  ;;  %v135_v2 = vld [vmem:[%s1753_s0 + $0x2a0] sm:$0xff]  ;;  %v137_v3 = vld [vmem:[%s1753_s0 + $0x2b0] sm:$0xff]  ;;  %929 = vmatpush1.bf16.msra.mxu0 %v928_v56  ;;  %v140_v6 = vld [vmem:[%s1753_s0 + $0x2c8] sm:$0xff]  ;;  %vm255_vm0 = vcmask 392192   ;;  %vm651_vm1 = vcmask 556032   ;;  %vm668_vm2 = vcmask 1041408  }
  0x53   :  { %v41_v4 = vld [vmem:[%s1754_s1 + $0xd0] sm:$0xff]  ;;  %v142_v7 = vld [vmem:[%s1753_s0 + $0x2d8] sm:$0xff]  ;;  %931 = vmatprep.subr.bf16.mxu0 %v930_v58  ;;  %359 = vmatprep.mubr.f32.mxu1 %v44_v61  ;;  %v816_v9 = vpack.c.bf16 %v137_v3, %v135_v2  ;;  %v40_v10 = vld [vmem:[%s1754_s1 + $0xc8] sm:$0xff]  ;;  %vm670_vm3 = vcmask 549888   ;;  %s991_s4 = smov [#allocation2]   ;;  %vm709_vm4 = vcmask 270336  }
  0x54   :  { %538 = vmatmul.mubr.f32.gmra.mrb[4].mxu0 %v33_v63  ;;  %360 = vmatmul.mubr.f32.gmra.mrb[8].mxu1 %v43_v0  ;;  %v18_v8 = vld [vmem:[%s1754_s1 + $0x18] sm:$0xff]  ;;  %v818_v11 = vpack.c.bf16 %v142_v7, %v140_v6  ;;  %v139_v12 = vld [vmem:[%s1753_s0 + $0x2c0] sm:$0xff]  ;;  %v141_v13 = vld [vmem:[%s1753_s0 + $0x2d0] sm:$0xff]  ;;  %s717_s5 = sshll.u32 %s991_s4, 4  ;;  %s718_s5 = int_to_ptr.vmem [resolvable:$true] %s717_s5 }
  0x55   :  { %813 = vmatpush1.bf16.msra.mxu1 %v812_v62  ;;  %543 = vmatprep.mubr.f32.mxu0 %v41_v4  ;;  %v48_v14 = vld [vmem:[%s1754_s1 + $0x108] sm:$0x3]  ;;  %v146_v16 = vld [vmem:[%s1753_s0 + $0x2f8] sm:$0xff]  ;;  %v820_v17 = vpack.c.bf16 %v141_v13, %v139_v12  ;;  %v47_v18 = vld [vmem:[%s1754_s1 + $0x100] sm:$0x3]  ;;  %s966_s6 = scalar_lea.vmem %s718_s5, 16  ;;  %p971_p1 = scmp.lt.s32.totalorder %s718_s5, %s718_s5 }
  0x56   :  { %815 = vmatprep.subr.bf16.mxu1 %v814_v1  ;;  %933 = vmatpush1.bf16.msra.mxu0 %v932_v5  ;;  %v144_v15 = vld [vmem:[%s1753_s0 + $0x2e8] sm:$0xff]  ;;  %v143_v20 = vld [vmem:[%s1753_s0 + $0x2e0] sm:$0xff]  ;;  %v145_v21 = vld [vmem:[%s1753_s0 + $0x2f0] sm:$0xff]  ;;  %p967_p0 = scmp.ne.s32.totalorder %s718_s5, %s966_s6  ;;  %s970_s7 = scalar_lea.vmem %s718_s5, 32 }
  0x57   :  { %430 = vmatprep.mubr.f32.mxu1 %v18_v8  ;;  %v822_v19 = vpack.c.bf16 %v146_v16, %v144_v15  ;;  %v148_v22 = vld [vmem:[%s1753_s0 + $0x308] sm:$0xff]  ;;  %v150_v23 = vld [vmem:[%s1753_s0 + $0x318] sm:$0xff]  ;;  %v824_v24 = vpack.c.bf16 %v145_v21, %v143_v20  ;;  %v21_v26 = vld [vmem:[%s1754_s1 + $0x30] sm:$0xff]  ;;  %p972_p2 = scmp.lt.s32.totalorder %s970_s7, %s966_s6 }
  0x58   :  { %544 = vmatmul.mubr.f32.gmra.mrb[6].mxu0 %v40_v10  ;;  %v826_v27 = vpack.c.bf16 %v150_v23, %v148_v22  ;;  %v147_v28 = vld [vmem:[%s1753_s0 + $0x300] sm:$0xff]  ;;  %v149_v29 = vld [vmem:[%s1753_s0 + $0x310] sm:$0xff]  ;;  %v152_v30 = vld [vmem:[%s1753_s0 + $0x328] sm:$0xff] }
  0x59   :  { %817 = vmatpush1.bf16.msra.mxu1 %v816_v9  ;;  %549 = vmatprep.mubr.f32.mxu0 %v48_v14  ;;  %v154_v31 = vld [vmem:[%s1753_s0 + $0x338] sm:$0xff]  ;;  %v828_v32 = vpack.c.bf16 %v149_v29, %v147_v28  ;;  %v28_v33 = vld [vmem:[%s1754_s1 + $0x68] sm:$0xff]  ;;  %v151_v35 = vld [vmem:[%s1753_s0 + $0x320] sm:$0xff]  ;;  %p973_p3 = por %p972_p2, %p971_p1 }
  0x5a   :  { %819 = vmatprep.subr.bf16.mxu1 %v818_v11  ;;  %v830_v34 = vpack.c.bf16 %v154_v31, %v152_v30  ;;  %v153_v36 = vld [vmem:[%s1753_s0 + $0x330] sm:$0xff]  ;;  %v156_v37 = vld [vmem:[%s1753_s0 + $0x348] sm:$0xff]  ;;  %v158_v38 = vld [vmem:[%s1753_s0 + $0x358] sm:$0xff] }
  0x5b   :  { %v832_v39 = vpack.c.bf16 %v153_v36, %v151_v35  ;;  %v35_v40 = vld [vmem:[%s1754_s1 + $0xa0] sm:$0xff]  ;;  %v834_v41 = vpack.c.bf16 %v158_v38, %v156_v37  ;;  %v157_v43 = vld [vmem:[%s1753_s0 + $0x350] sm:$0xff]  ;;  %v160_v44 = vld [vmem:[%s1753_s0 + $0x368] sm:$0xff]  ;;  %p974_p4 = pnand %p973_p3, %p967_p0 }
  0x5c   :  { %550 = vmatmul.mubr.f32.gmra.mrb[8].mxu0 %v47_v18  ;;  %v155_v42 = vld [vmem:[%s1753_s0 + $0x340] sm:$0xff]  ;;  %v162_v45 = vld [vmem:[%s1753_s0 + $0x378] sm:$0xff]  ;;  %v161_v50 = vld [vmem:[%s1753_s0 + $0x370] sm:$0xff] }
  0x5d   :  { %821 = vmatpush1.bf16.msra.mxu1 %v820_v17  ;;  %620 = vmatprep.mubr.f32.mxu0 %v990_v25  ;;  %v836_v46 = vpack.c.bf16 %v157_v43, %v155_v42  ;;  %v42_v47 = vld [vmem:[%s1754_s1 + $0xd8] sm:$0xff]  ;;  %v838_v48 = vpack.c.bf16 %v162_v45, %v160_v44  ;;  %v159_v49 = vld [vmem:[%s1753_s0 + $0x360] sm:$0xff]  ;;  %v164_v51 = vld [vmem:[%s1753_s0 + $0x388] sm:$0xff] }
  0x5e   :  { %823 = vmatprep.subr.bf16.mxu1 %v822_v19  ;;  %v166_v52 = vld [vmem:[%s1753_s0 + $0x398] sm:$0xff]  ;;  %v840_v53 = vpack.c.bf16 %v161_v50, %v159_v49  ;;  %v49_v54 = vld [vmem:[%s1754_s1 + $0x110] sm:$0x3]  ;;  %v163_v56 = vld [vmem:[%s1753_s0 + $0x380] sm:$0xff] }
  0x5f   :  { %v842_v55 = vpack.c.bf16 %v166_v52, %v164_v51  ;;  %v165_v57 = vld [vmem:[%s1753_s0 + $0x390] sm:$0xff]  ;;  %v168_v58 = vld [vmem:[%s1753_s0 + $0x3a8] sm:$0xff]  ;;  %v170_v59 = vld [vmem:[%s1753_s0 + $0x3b8] sm:$0xff] }
  0x60   :  { %725 = vmatmul.mubr.msk.f32.vlgmr.msra.gmra.mrb[0].mxu0 %vm255_vm0, %v21_v26  ;;  %v844_v60 = vpack.c.bf16 %v165_v57, %v163_v56  ;;  %v846_v61 = vpack.c.bf16 %v170_v59, %v168_v58  ;;  %v167_v62 = vld [vmem:[%s1753_s0 + $0x3a0] sm:$0xff]  ;;  %v169_v63 = vld [vmem:[%s1753_s0 + $0x3b0] sm:$0xff]  ;;  %v172_v0 = vld [vmem:[%s1753_s0 + $0x3c8] sm:$0xff] }
  0x61   :  { %825 = vmatpush1.bf16.msra.mxu1 %v824_v24  ;;  %626 = vmatprep.mubr.f32.mxu0 %v990_v25  ;;  %v174_v1 = vld [vmem:[%s1753_s0 + $0x3d8] sm:$0xff]  ;;  %v848_v2 = vpack.c.bf16 %v169_v63, %v167_v62  ;;  %v171_v4 = vld [vmem:[%s1753_s0 + $0x3c0] sm:$0xff]  ;;  %v173_v5 = vld [vmem:[%s1753_s0 + $0x3d0] sm:$0xff] }
  0x62   :  { %827 = vmatprep.subr.bf16.mxu1 %v826_v27  ;;  %v850_v3 = vpack.c.bf16 %v174_v1, %v172_v0  ;;  %v176_v6 = vld [vmem:[%s1753_s0 + $0x3e8] sm:$0xff]  ;;  %v178_v7 = vld [vmem:[%s1753_s0 + $0x3f8] sm:$0xff]  ;;  %v852_v8 = vpack.c.bf16 %v173_v5, %v171_v4  ;;  %v175_v10 = vld [vmem:[%s1753_s0 + $0x3e0] sm:$0xff] }
  0x63   :  { %v854_v9 = vpack.c.bf16 %v178_v7, %v176_v6  ;;  %v177_v11 = vld [vmem:[%s1753_s0 + $0x3f0] sm:$0xff]  ;;  %v24_v15 = vld [vmem:[%s1754_s1 + $0x48] sm:$0xff]  ;;  %v31_v17 = vld [vmem:[%s1754_s1 + $0x80] sm:$0xff] }
  0x64   :  { %726 = vmatmul.mubr.msk.f32.gmra.mrb[2].mxu0 %vm255_vm0, %v28_v33  ;;  %v856_v12 = vpack.c.bf16 %v177_v11, %v175_v10  ;;  %v17_v13 = vld [vmem:[%s1754_s1 + $0x10] sm:$0xff]  ;;  %v32_v16 = vld [vmem:[%s1754_s1 + $0x88] sm:$0xff]  ;;  %v39_v18 = vld [vmem:[%s1754_s1 + $0xc0] sm:$0xff] }
  0x65   :  { %829 = vmatpush1.bf16.msra.mxu1 %v828_v32  ;;  %632 = vmatprep.mubr.f32.mxu0 %v990_v25  ;;  %v25_v14 = vld [vmem:[%s1754_s1 + $0x50] sm:$0xff]  ;;  %v38_v19 = vld [vmem:[%s1754_s1 + $0xb8] sm:$0xff]  ;;  %v50_v4 = vld [vmem:[%s1755_s2] sm:$0x1] }
  0x66   :  { %831 = vmatprep.subr.bf16.mxu1 %v830_v34  ;;  %v46_v20 = vld [vmem:[%s1754_s1 + $0xf8] sm:$0x3]  ;;  %v45_v21 = vld [vmem:[%s1754_s1 + $0xf0] sm:$0x3] }
  0x68   :  { %727 = vmatmul.mubr.msk.f32.gmra.mrb[4].mxu0 %vm255_vm0, %v35_v40 }
  0x69   :  { %833 = vmatpush1.bf16.msra.mxu1 %v832_v39  ;;  %638 = vmatprep.mubr.f32.mxu0 %v990_v25 }
  0x6a   :  { %835 = vmatprep.subr.bf16.mxu1 %v834_v41 }
  0x6c   :  { %728 = vmatmul.mubr.msk.f32.gmra.mrb[6].mxu0 %vm255_vm0, %v42_v47 }
  0x6d   :  { %837 = vmatpush1.bf16.msra.mxu1 %v836_v46  ;;  %644 = vmatprep.mubr.f32.mxu0 %v990_v25 }
  0x6e   :  { %839 = vmatprep.subr.bf16.mxu1 %v838_v48 }
  0x70   :  { %729 = vmatmul.mubr.msk.f32.gmra.mrb[8].mxu0 %vm255_vm0, %v49_v54 }
  0x71   :  { %841 = vmatpush1.bf16.msra.mxu1 %v840_v53 }
  0x72   :  { %843 = vmatprep.subr.bf16.mxu1 %v842_v55 }
  0x75   :  { %845 = vmatpush1.bf16.msra.mxu1 %v844_v60 }
  0x76   :  { %847 = vmatprep.subr.bf16.mxu1 %v846_v61 }
  0x79   :  { %849 = vmatpush1.bf16.msra.mxu1 %v848_v2 }
  0x7a   :  { %851 = vmatprep.subr.bf16.mxu1 %v850_v3 }
  0x7d   :  { %853 = vmatpush1.bf16.msra.mxu1 %v852_v8 }
  0x7e   :  { %855 = vmatprep.subr.bf16.mxu1 %v854_v9 }
  0x81   :  { %857 = vmatpush1.bf16.msra.mxu1 %v856_v12 }
  0x84   :  { %431 = vmatmul.mubr.f32.vlgmr.msra.gmra.mrb[0].mxu1 %v17_v13 }
  0x85   :  { %436 = vmatprep.mubr.f32.mxu1 %v25_v14 }
  0x88   :  { %437 = vmatmul.mubr.f32.gmra.mrb[2].mxu1 %v24_v15 }
  0x89   :  { %442 = vmatprep.mubr.f32.mxu1 %v32_v16 }
  0x8c   :  { %443 = vmatmul.mubr.f32.gmra.mrb[4].mxu1 %v31_v17 }
  0x8d   :  { %448 = vmatprep.mubr.f32.mxu1 %v39_v18 }
  0x90   :  { %449 = vmatmul.mubr.f32.gmra.mrb[6].mxu1 %v38_v19 }
  0x91   :  { %454 = vmatprep.mubr.f32.mxu1 %v46_v20 }
  0x94   :  { %455 = vmatmul.mubr.f32.gmra.mrb[8].mxu1 %v45_v21 }
 0x133   :  { %v622_v22 = vpop.f32.mrb[0].mxu0 }
 0x134   :  { %v624_v23 = vpop.f32.mrb[1].mxu0 }
 0x137   :  { %v628_v24 = vpop.f32.mrb[2].mxu0 }
 0x138   :  { %v630_v25 = vpop.f32.mrb[3].mxu0 }
 0x13b   :  { %v634_v26 = vpop.f32.mrb[4].mxu0 }
 0x13c   :  { %v636_v27 = vpop.f32.mrb[5].mxu0 }
 0x13f   :  { %v640_v28 = vpop.f32.mrb[6].mxu0 }
 0x140   :  { %v642_v29 = vpop.f32.mrb[7].mxu0 }
 0x143   :  { %v646_v30 = vpop.f32.mrb[8].mxu0 }
 0x144   :  { %v648_v31 = vpop.f32.mrb[9].mxu0 }
 0x157   :  { %v432_v32 = vpop.f32.mrb[0].mxu1 }
 0x158   :  { %v934_v33 = vadd.f32 %v622_v22, %v432_v32  ;;  %v434_v34 = vpop.f32.mrb[1].mxu1 }
 0x159   :  { %v935_v35 = vadd.f32 %v624_v23, %v434_v34 }
 0x15b   :  { %v438_v36 = vpop.f32.mrb[2].mxu1  ;;  %v652_v37 = vsel %vm651_vm1, %v935_v35, 0.0 }
 0x15c   :  { %v936_v38 = vadd.f32 %v628_v24, %v438_v36  ;;  %v440_v39 = vpop.f32.mrb[3].mxu1  ;;  %v653_v40 = vadd.f32 %v934_v33, %v652_v37 }
 0x15d   :  { %v937_v41 = vadd.f32 %v630_v25, %v440_v39 }
 0x15e   :  { %654 = vadd.xlane.f32.xlu0 %v653_v40 }
 0x15f   :  { %v444_v42 = vpop.f32.mrb[4].mxu1  ;;  %v656_v43 = vsel %vm651_vm1, %v937_v41, 0.0 }
 0x160   :  { %v938_v44 = vadd.f32 %v634_v26, %v444_v42  ;;  %v446_v45 = vpop.f32.mrb[5].mxu1  ;;  %v657_v46 = vadd.f32 %v936_v38, %v656_v43 }
 0x161   :  { %v939_v47 = vadd.f32 %v636_v27, %v446_v45 }
 0x162   :  { %658 = vadd.xlane.f32.xlu0 %v657_v46 }
 0x163   :  { %v450_v48 = vpop.f32.mrb[6].mxu1  ;;  %v660_v49 = vsel %vm651_vm1, %v939_v47, 0.0 }
 0x164   :  { %v940_v50 = vadd.f32 %v640_v28, %v450_v48  ;;  %v452_v51 = vpop.f32.mrb[7].mxu1  ;;  %v661_v52 = vadd.f32 %v938_v44, %v660_v49 }
 0x165   :  { %v941_v53 = vadd.f32 %v642_v29, %v452_v51 }
 0x166   :  { %662 = vadd.xlane.f32.xlu1 %v661_v52 }
 0x167   :  { %v456_v54 = vpop.f32.mrb[8].mxu1  ;;  %v664_v55 = vsel %vm651_vm1, %v941_v53, 0.0 }
 0x168   :  { %v942_v56 = vadd.f32 %v646_v30, %v456_v54  ;;  %v458_v57 = vpop.f32.mrb[9].mxu1  ;;  %v665_v58 = vadd.f32 %v940_v50, %v664_v55 }
 0x169   :  { %v943_v59 = vadd.f32 %v648_v31, %v458_v57 }
 0x16a   :  { %666 = vadd.xlane.f32.xlu1 %v665_v58  ;;  %v669_v60 = vsel %vm668_vm2, %v942_v56, 0.0 }
 0x16b   :  { %v671_v61 = vsel %vm670_vm3, %v943_v59, 0.0 }
 0x16c   :  { %v672_v62 = vadd.f32 %v671_v61, %v669_v60 }
 0x16e   :  { %673 = vadd.xlane.f32.xlu0 %v672_v62 }
 0x1eb   :  { %v655_v63 = vpop.xlane.xlu0 %654 }
 0x1ec   :  { %675 = vxpose.xlu1.b32.start [1/5] (short) (narrow) %v655_v63, 8 }
 0x1ef   :  { %v659_v0 = vpop.xlane.xlu0 %658 }
 0x1f0   :  { %676 = vxpose.xlu1.b32.cont [2/5] (short) (narrow) %v659_v0, 8 }
 0x1f3   :  { %v663_v1 = vpop.xlane.xlu1 %662 }
 0x1f4   :  { %677 = vxpose.xlu1.b32.cont [3/5] (short) (narrow) %v663_v1, 8 }
 0x1f7   :  { %v667_v2 = vpop.xlane.xlu1 %666 }
 0x1f8   :  { %678 = vxpose.xlu1.b32.cont [4/5] (short) (narrow) %v667_v2, 8 }
 0x1fb   :  { %v674_v3 = vpop.xlane.xlu0 %673 }
 0x1fc   :  { %679 = vxpose.xlu1.b32.end [5/5] (short) (narrow) %v674_v3, 8 }
 0x26c   :  { %v691_v5 = vpop.trf.xlu1 }
 0x26d   :  { %v707_v6 = vmul.f32 0.0051020407, %v691_v5 }
 0x26f   :  { %v708_v7 = vadd.f32 %v707_v6, %v50_v4 }
 0x271   :  { %710 = vst.msk [vmem:[#allocation2] sm:$0x1] %vm709_vm4, %v708_v7 }
 0x272   :  { %977 = shalt.err (!%p974_p4)
}
 0x273   :  { %s978_s2 = scalar_lea.hbm %s1756_s3, 16 }
 0x274   :  { %p979_p5 = scmp.ne.s32.totalorder %s1756_s3, %s978_s2  ;;  %p982_p6 = scmp.lt.u32.totalorder %s978_s2, %s1756_s3 }
 0x276   :  { %p984_p7 = pnand %p982_p6, %p979_p5 }
 0x278   :  { %987 = shalt.err (!%p984_p7)
}
 0x279   :  { %720 = dma.vmem_to_hbm [thread:$0]  %s718_s5, 16, %s1756_s3, [#allocation3]  }
 0x27a   :  { %988 = dma.done.wait [#allocation3], 16  }
 0x27b   :  { %989 = vsyncadd [#allocation3], 4294967280 }
 0x27c   :  { %724 = vsyncpa [#allocation3], 1 }

</bundles_post_ra>
